<compile_context>
chip_gen: v6e
topology: v6e:2x2x1
jax: 0.10.0
libtpu: 0.0.40
codegen_flags: <defaults>
</compile_context>

<pallas_src>
import jax
import jax.numpy as jnp
from jax import lax
from jax.experimental import pallas as pl
from jax.experimental.pallas import tpu as pltpu


def _make_kernel(mode_c, mode_E, lambda0, T, K, epsilon):
    Kp1 = K + 1

    def kernel(x_ref, m_ref, bias_ref, out_ref):
        # x_ref: (TB, d*n)   m_ref: (d*n, K+1)   bias_ref: (1, K+1)
        # out_ref: (TB, K+2) -- col 0 = per-row scalar output, cols 1: = matrix output
        logits = jnp.dot(x_ref[...], m_ref[...],
                         preferred_element_type=jnp.float32) + bias_ref[...]   # (TB, K+1)
        ids = lax.broadcasted_iota(jnp.int32, logits.shape, 1)
        is_last = ids == (Kp1 - 1)

        if mode_c == "max":
            mx = jnp.max(logits, axis=1, keepdims=True)
            cand = jnp.where(logits == mx, ids, jnp.int32(Kp1))
            vec = jnp.min(cand, axis=1, keepdims=True).astype(jnp.float32)     # first argmax
            mat = logits
        else:  # mode_c == "score"
            if mode_E in ("e", "e_T"):
                t = 1.0 if mode_E == "e" else T
                z = logits / t
                zmax = jnp.max(z, axis=1, keepdims=True)        # stable softmax (same value)
                ez = jnp.exp(z - zmax)
                # max over p[:, :-1] == max(ez[:, :-1]) / sum(ez)  (positive per-row scalar)
                num = jnp.max(jnp.where(is_last, -jnp.inf, ez), axis=1, keepdims=True)
                score0 = num / jnp.sum(ez, axis=1, keepdims=True)              # (TB, 1)
            else:  # "log_T"
                z = logits / T
                zm = jnp.max(jnp.where(is_last, -jnp.inf, z), axis=1, keepdims=True)
                ez = jnp.where(is_last, 0.0, jnp.exp(z - zm))
                score0 = T * (zm + jnp.log(jnp.sum(ez, axis=1, keepdims=True)))

            ood = jnp.where(is_last, 1.0, 0.0).astype(jnp.float32)             # OOD row
            x_mod = jnp.where(is_last, 0.0, logits)                            # x[:, -1] = 0
            biclas = jnp.where(score0 < lambda0, ood, x_mod)                   # (TB, K+1)

            masked = jnp.where(is_last, -jnp.inf, biclas)                      # biclas[:, :-1]
            max_value = jnp.max(masked, axis=1, keepdims=True)                 # (TB, 1)
            cand = jnp.where(jnp.logical_and(masked == max_value,
                                             jnp.logical_not(is_last)),
                             ids, jnp.int32(Kp1))
            hat_c = jnp.min(cand, axis=1, keepdims=True).astype(jnp.float32)
            vec = jnp.where(max_value < epsilon, jnp.float32(K), hat_c)
            mat = biclas

        out_ref[:, 0:1] = vec
        out_ref[:, 1:] = mat

    return kernel


def classifier_forward(x, w1, b1, w2, b2, *, mode_c="max", mode_E="e_T",
                       lambda0=0.5, T=2.0, epsilon=1e-7, block_b=None,
                       compute_dtype=jnp.float32):
    if mode_c not in ("max", "score"):
        raise ValueError("no such kind of classifier")
    if mode_c == "score" and mode_E not in ("e", "e_T", "log_T"):
        raise ValueError("no such kind of scoring function")

    B, d, n = x.shape
    Kp1 = w2.shape[0]
    K = Kp1 - 1
    dn = d * n
    bytes_x = jnp.dtype(compute_dtype).itemsize

    # ---- fuse linear + linear1 into one matmul with batch on the MXU M axis ----
    w1f = jnp.asarray(w1, jnp.float32)                    # (1, d)
    w2t = jnp.asarray(w2, jnp.float32).T                  # (n, K+1)
    M = (w1f[0][:, None, None] * w2t[None, :, :]).reshape(dn, Kp1)            # (d*n, K+1)
    M = M.astype(compute_dtype)
    biasp = (jnp.asarray(b1, jnp.float32)[0] * jnp.sum(w2t, axis=0)
             + jnp.asarray(b2, jnp.float32)).reshape(1, Kp1)                   # (1, K+1)

    x_flat = jnp.asarray(x).reshape(B, dn).astype(compute_dtype)               # no host pad

    # ---- batch tiling: large tiles (amortize ~0.35us/step), no host-side padding ----
    if block_b is None:
        vmem_budget = 16 * 1024 * 1024                    # double-buffered x-tile budget
        cap = vmem_budget // (2 * dn * bytes_x)
        tb = max(8, (min(4096, cap) // 8) * 8)            # <=4096: keep epilogue vregs sane
        if B > 16:                                        # >=2 grid steps -> v7x's 2 TCs busy
            tb = min(tb, max(8, ((pl.cdiv(B, 2) + 7) // 8) * 8))
        block_b = min(tb, max(8, ((B + 7) // 8) * 8))
    TB = max(8, (int(block_b) // 8) * 8)
    grid_b = pl.cdiv(B, TB)                               # ragged tail handled by Pallas

    kernel = _make_kernel(mode_c, mode_E, float(lambda0), float(T), K, float(epsilon))

    vmem_est = (2 * TB * dn * bytes_x                      # double-buffered x tile
                + 2 * dn * Kp1 * bytes_x + 2 * Kp1 * 4     # M + bias
                + 2 * TB * (Kp1 + 1) * 4)                  # double-buffered output tile
    vmem_lim = int(min(28 * 1024 * 1024, max(4 * 1024 * 1024, 2 * vmem_est)))

    cost = pl.CostEstimate(
        flops=2 * B * dn * Kp1 + 16 * B * Kp1,
        transcendentals=(B * Kp1 if mode_c == "score" else 0),
        bytes_accessed=B * dn * bytes_x + dn * Kp1 * bytes_x + B * (Kp1 + 1) * 4 + Kp1 * 4)

    out = pl.pallas_call(
        kernel,
        out_shape=jax.ShapeDtypeStruct((B, Kp1 + 1), jnp.float32),
        grid_spec=pltpu.PrefetchScalarGridSpec(
            num_scalar_prefetch=0,
            grid=(grid_b,),
            in_specs=[pl.BlockSpec((TB, dn), lambda b: (b, 0)),
                      pl.BlockSpec((dn, Kp1), lambda b: (0, 0)),
                      pl.BlockSpec((1, Kp1), lambda b: (0, 0))],
            out_specs=pl.BlockSpec((TB, Kp1 + 1), lambda b: (b, 0))),
        compiler_params=pltpu.CompilerParams(
            dimension_semantics=("parallel",),
            vmem_limit_bytes=vmem_lim),
        cost_estimate=cost,
    )(x_flat, M, biasp)

    out_vec = out[:, 0]
    out_mat = out[:, 1:]
    if mode_c == "max":
        out_vec = out_vec.astype(jnp.int32)
    return out_vec, out_mat


# ----------------------- plain-JAX reference (for checking) -----------------------
def _score_ref(logits, mode_E, T):
    if mode_E == "e":
        p = jnp.exp(logits) / jnp.sum(jnp.exp(logits), axis=1, keepdims=True)
        return jnp.max(p[:, :-1], axis=1)
    if mode_E == "e_T":
        p = jnp.exp(logits / T) / jnp.sum(jnp.exp(logits / T), axis=1, keepdims=True)
        return jnp.max(p[:, :-1], axis=1)
    return T * jnp.log(jnp.sum(jnp.exp(logits[:, :-1] / T), axis=1))


def reference_forward(x, w1, b1, w2, b2, *, mode_c, mode_E, lambda0, T, epsilon):
    h = jnp.einsum("bdn,d->bn", x, w1[0]) + b1[0]
    logits = h @ w2.T + b2
    K = w2.shape[0] - 1
    if mode_c == "max":
        return jnp.argmax(logits, axis=1).astype(jnp.int32), logits
    score0 = _score_ref(logits, mode_E, T)
    score = jnp.broadcast_to(score0[:, None], logits.shape)
    ood = jnp.zeros_like(logits).at[:, -1].set(1.0)
    x_mod = logits.at[:, -1].set(0.0)
    biclas = jnp.where(score < lambda0, ood, x_mod)
    max_value = jnp.max(biclas[:, :-1], axis=1)
    hat_c = jnp.argmax(biclas[:, :-1], axis=1)
    output = jnp.where(max_value < epsilon, float(K), hat_c.astype(jnp.float32))
    return output, biclas


if __name__ == "__main__":
    d, n, K = 32, 8, 4
    key = jax.random.PRNGKey(0)
    k1, k2, k3, k4, kx1, kx2 = jax.random.split(key, 6)

    bound1 = 1.0 / (d ** 0.5)
    w1 = jax.random.uniform(k1, (1, d), jnp.float32, -bound1, bound1)
    b1 = jax.random.uniform(k2, (1,), jnp.float32, -bound1, bound1)
    bound2 = 1.0 / (n ** 0.5)
    w2 = jax.random.uniform(k3, (K + 1, n), jnp.float32, -bound2, bound2)
    b2 = jax.random.uniform(k4, (K + 1,), jnp.float32, -bound2, bound2)

    # ---- small batch, single (partial) block ----
    B = 2
    x = jax.random.normal(kx1, (B, d, n), jnp.float32)

    out_max, logits = classifier_forward(x, w1, b1, w2, b2, mode_c="max")
    jax.block_until_ready((out_max, logits))
    ref_out_max, ref_logits = reference_forward(
        x, w1, b1, w2, b2, mode_c="max", mode_E="e_T", lambda0=0.25, T=2.0, epsilon=1e-7)
    assert jnp.allclose(logits, ref_logits, atol=1e-4, rtol=1e-4)
    assert bool(jnp.all(out_max == ref_out_max))

    out_sc, biclas = classifier_forward(
        x, w1, b1, w2, b2, mode_c="score", mode_E="e_T", lambda0=0.25, T=2.0)
    jax.block_until_ready((out_sc, biclas))
    ref_out_sc, ref_biclas = reference_forward(
        x, w1, b1, w2, b2, mode_c="score", mode_E="e_T", lambda0=0.25, T=2.0, epsilon=1e-7)
    assert jnp.allclose(biclas, ref_biclas, atol=1e-4, rtol=1e-4)
    assert jnp.allclose(out_sc, ref_out_sc, atol=1e-4, rtol=1e-4)

    # ---- larger batch: default tiling (>=2 grid steps, ragged last block, no host pad) ----
    B2 = 20
    x2 = jax.random.normal(kx2, (B2, d, n), jnp.float32)

    out_max2, logits2 = classifier_forward(x2, w1, b1, w2, b2, mode_c="max")
    jax.block_until_ready((out_max2, logits2))
    ref_out_max2, ref_logits2 = reference_forward(
        x2, w1, b1, w2, b2, mode_c="max", mode_E="e_T", lambda0=0.25, T=2.0, epsilon=1e-7)
    assert jnp.allclose(logits2, ref_logits2, atol=1e-4, rtol=1e-4)
    assert bool(jnp.all(out_max2 == ref_out_max2))

    # ---- explicit small block: 3-step grid with a partial tail block ----
    out_lt, biclas_lt = classifier_forward(
        x2, w1, b1, w2, b2, mode_c="score", mode_E="log_T", lambda0=0.25, T=2.0, block_b=8)
    jax.block_until_ready((out_lt, biclas_lt))
    ref_out_lt, ref_biclas_lt = reference_forward(
        x2, w1, b1, w2, b2, mode_c="score", mode_E="log_T", lambda0=0.25, T=2.0, epsilon=1e-7)
    assert jnp.allclose(biclas_lt, ref_biclas_lt, atol=1e-4, rtol=1e-4)
    assert jnp.allclose(out_lt, ref_out_lt, atol=1e-4, rtol=1e-4)

    out_e, biclas_e = classifier_forward(
        x2, w1, b1, w2, b2, mode_c="score", mode_E="e", lambda0=0.25, T=2.0, block_b=8)
    jax.block_until_ready((out_e, biclas_e))
    ref_out_e, ref_biclas_e = reference_forward(
        x2, w1, b1, w2, b2, mode_c="score", mode_E="e", lambda0=0.25, T=2.0, epsilon=1e-7)
    assert jnp.allclose(biclas_e, ref_biclas_e, atol=1e-4, rtol=1e-4)
    assert jnp.allclose(out_e, ref_out_e, atol=1e-4, rtol=1e-4)

    print("KERNEL_OK")
</pallas_src>

<mosaic_0001>
module attributes {stable_mosaic.version = 11 : i64} {
  func.func @kernel(%arg0: i32, %arg1: memref<8x256xf32, #tpu.memory_space<vmem>>, %arg2: memref<256x5xf32, #tpu.memory_space<vmem>>, %arg3: memref<1x5xf32, #tpu.memory_space<vmem>>, %arg4: memref<8x6xf32, #tpu.memory_space<vmem>>) attributes {dimension_semantics = [#tpu.dimension_semantics<parallel>], iteration_bounds = array<i64: 1>, scalar_prefetch = 0 : i64, scratch_operands = 0 : i64, tpu.core_type = #tpu.core_type<tc>, window_params = [{transform_indices = @transform_0, window_bounds = array<i64: 8, 256>}, {pipeline_mode = #tpu.pipeline_mode<synchronous>, transform_indices = @transform_1, window_bounds = array<i64: 256, 5>}, {pipeline_mode = #tpu.pipeline_mode<synchronous>, transform_indices = @transform_2, window_bounds = array<i64: 1, 5>}, {transform_indices = @transform_3, window_bounds = array<i64: 8, 6>}]} {
    %c0 = arith.constant 0 : index
    %c0_0 = arith.constant 0 : index
    %0 = vector.load %arg1[%c0, %c0_0] : memref<8x256xf32, #tpu.memory_space<vmem>>, vector<8x256xf32>
    %c0_1 = arith.constant 0 : index
    %c0_2 = arith.constant 0 : index
    %1 = vector.load %arg2[%c0_1, %c0_2] : memref<256x5xf32, #tpu.memory_space<vmem>>, vector<256x5xf32>
    %cst = arith.constant dense<0.000000e+00> : vector<8x5xf32>
    %2 = tpu.matmul %0, %1, %cst {dimension_numbers = #tpu.dot_dimension_numbers<[1], [0], [0], [1], [0, 0, 1, 1], [], []>} : vector<8x256xf32>, vector<256x5xf32>, vector<8x5xf32> -> vector<8x5xf32>
    %c0_3 = arith.constant 0 : index
    %c0_4 = arith.constant 0 : index
    %3 = vector.load %arg3[%c0_3, %c0_4] : memref<1x5xf32, #tpu.memory_space<vmem>>, vector<1x5xf32>
    %4 = vector.broadcast %3 : vector<1x5xf32> to vector<8x5xf32>
    %5 = arith.addf %2, %4 : vector<8x5xf32>
    %6 = tpu.iota {dimensions = array<i32: 1>} : vector<8x5xi32>
    %cst_5 = arith.constant dense<0xFF800000> : vector<8xf32>
    %7 = vector.multi_reduction <maximumf>, %5, %cst_5 [1] : vector<8x5xf32> to vector<8xf32>
    %8 = vector.shape_cast %7 : vector<8xf32> to vector<8x1xf32>
    %9 = vector.broadcast %8 : vector<8x1xf32> to vector<8x5xf32>
    %10 = arith.cmpf oeq, %5, %9 : vector<8x5xf32>
    %c5_i32 = arith.constant 5 : i32
    %11 = vector.broadcast %c5_i32 : i32 to vector<8x5xi32>
    %12 = arith.select %10, %6, %11 : vector<8x5xi1>, vector<8x5xi32>
    %cst_6 = arith.constant dense<2147483647> : vector<8xi32>
    %13 = vector.multi_reduction <minsi>, %12, %cst_6 [1] : vector<8x5xi32> to vector<8xi32>
    %14 = vector.shape_cast %13 : vector<8xi32> to vector<8x1xi32>
    %15 = arith.sitofp %14 : vector<8x1xi32> to vector<8x1xf32>
    %c0_7 = arith.constant 0 : index
    %c0_8 = arith.constant 0 : index
    %16 = vector.load %arg4[%c0_7, %c0_8] : memref<8x6xf32, #tpu.memory_space<vmem>>, vector<8x1xf32>
    tpu.vector_store %arg4[%c0_7, %c0_8], %15 {strides = array<i32>} : memref<8x6xf32, #tpu.memory_space<vmem>>, vector<8x1xf32>,
    %c0_9 = arith.constant 0 : index
    %c1 = arith.constant 1 : index
    %17 = vector.load %arg4[%c0_9, %c1] : memref<8x6xf32, #tpu.memory_space<vmem>>, vector<8x5xf32>
    tpu.vector_store %arg4[%c0_9, %c1], %5 {strides = array<i32>} : memref<8x6xf32, #tpu.memory_space<vmem>>, vector<8x5xf32>,
    return
  }
  func.func @transform_0(%arg0: i32) -> (i32, i32) {
    %c0_i32 = arith.constant 0 : i32
    %c0_i32_0 = arith.constant 0 : i32
    return %arg0, %c0_i32 : i32, i32
  }
  func.func @transform_1(%arg0: i32) -> (i32, i32) {
    %c0_i32 = arith.constant 0 : i32
    %c0_i32_0 = arith.constant 0 : i32
    %c0_i32_1 = arith.constant 0 : i32
    return %c0_i32, %c0_i32_0 : i32, i32
  }
  func.func @transform_2(%arg0: i32) -> (i32, i32) {
    %c0_i32 = arith.constant 0 : i32
    %c0_i32_0 = arith.constant 0 : i32
    %c0_i32_1 = arith.constant 0 : i32
    return %c0_i32, %c0_i32_0 : i32, i32
  }
  func.func @transform_3(%arg0: i32) -> (i32, i32) {
    %c0_i32 = arith.constant 0 : i32
    %c0_i32_0 = arith.constant 0 : i32
    return %arg0, %c0_i32 : i32, i32
  }
}

</mosaic_0001>

<bundles_post_ra>
// kernel: tpu_custom_call.1
= control target key start
LH: loop header
LB: loop body
LE: loop exit
PB: predicated region body
PF: predicated region fallthrough
CT: control target
= control target key end

     0   :  { %8 = vsyncpa [#allocation3], 0  ;;  %v67_v5 = vlaneseq  ;;  %vm154_vm0 = vcmask 39936   ;;  %vm176_vm3 = vcmask 7168   ;;  %vm182_vm4 = vcmask 48136   ;;  %s400_s0 = inlined_call_operand.vmem [shape: f32[2,256], index: 0, kind: input, shape index: {}]   ;;  %s401_s1 = inlined_call_operand.vmem [shape: f32[256,5], index: 1, kind: input, shape index: {}]   ;;  %s402_s2 = inlined_call_operand.vmem [shape: f32[1,5], index: 2, kind: input, shape index: {}]   ;;  %s403_s3 = inlined_call_operand.hbm [shape: f32[2,6], index: 3, kind: output, shape index: {}]  }
   0x1   :  { %v50_v0 = vld [vmem:[%s401_s1 + $0xf8] sm:$0xff]  ;;  %v49_v2 = vld [vmem:[%s401_s1 + $0xf0] sm:$0xff]  ;;  %v48_v4 = vld [vmem:[%s401_s1 + $0xe8] sm:$0xff] }
   0x2   :  { %v34_v1 = vld [vmem:[%s401_s1 + $0x78] sm:$0xff]  ;;  %201 = vmatprep.subr.mxu0 %v50_v0  ;;  %v33_v3 = vld [vmem:[%s401_s1 + $0x70] sm:$0xff]  ;;  %v32_v6 = vld [vmem:[%s401_s1 + $0x68] sm:$0xff]  ;;  %v153_v43 = vand.u32 127, %v67_v5 }
   0x3   :  { %202 = vmatpush3.msra.mxu0 %v34_v1  ;;  %v47_v7 = vld [vmem:[%s401_s1 + $0xe0] sm:$0xff]  ;;  %v46_v9 = vld [vmem:[%s401_s1 + $0xd8] sm:$0xff]  ;;  %v45_v11 = vld [vmem:[%s401_s1 + $0xd0] sm:$0xff] }
   0x4   :  { %203 = vmatprep.subr.mxu0 %v49_v2  ;;  %v31_v8 = vld [vmem:[%s401_s1 + $0x60] sm:$0xff]  ;;  %v30_v10 = vld [vmem:[%s401_s1 + $0x58] sm:$0xff]  ;;  %v29_v12 = vld [vmem:[%s401_s1 + $0x50] sm:$0xff] }
   0x5   :  { %204 = vmatpush3.msra.mxu0 %v33_v3  ;;  %v44_v13 = vld [vmem:[%s401_s1 + $0xc8] sm:$0xff]  ;;  %v43_v15 = vld [vmem:[%s401_s1 + $0xc0] sm:$0xff]  ;;  %v42_v19 = vld [vmem:[%s401_s1 + $0xb8] sm:$0xff] }
   0x6   :  { %205 = vmatprep.subr.mxu0 %v48_v4  ;;  %v28_v14 = vld [vmem:[%s401_s1 + $0x48] sm:$0xff]  ;;  %v243_v16 = vld.sshfl [vmem:[%s400_s0] sm:$0xff pattern:$0x76325410]  ;;  %v26_v20 = vld [vmem:[%s401_s1 + $0x38] sm:$0xff] }
   0x7   :  { %206 = vmatpush3.msra.mxu0 %v32_v6  ;;  %v244_v17 = vld.sshfl [vmem:[%s400_s0 + $0x8] sm:$0xff pattern:$0x76325410]  ;;  %v27_v18 = vld [vmem:[%s401_s1 + $0x40] sm:$0xff]  ;;  %v41_v21 = vld [vmem:[%s401_s1 + $0xb0] sm:$0xff] }
   0x8   :  { %207 = vmatprep.subr.mxu0 %v47_v7  ;;  %v79_v22 = vcombine.high %v243_v16, %v244_v17  ;;  %v25_v23 = vld [vmem:[%s401_s1 + $0x30] sm:$0xff]  ;;  %v40_v24 = vld [vmem:[%s401_s1 + $0xa8] sm:$0xff]  ;;  %v39_v26 = vld [vmem:[%s401_s1 + $0xa0] sm:$0xff]  ;;  %v78_v36 = vcombine.low %v243_v16, %v244_v17 }
   0x9   :  { %208 = vmatpush3.msra.mxu0 %v31_v8  ;;  %v24_v25 = vld [vmem:[%s401_s1 + $0x28] sm:$0xff]  ;;  %v23_v27 = vld [vmem:[%s401_s1 + $0x20] sm:$0xff]  ;;  %v38_v28 = vld [vmem:[%s401_s1 + $0x98] sm:$0xff] }
   0xa   :  { %209 = vmatprep.subr.mxu0 %v46_v9  ;;  %146 = vmatprep.mubr.f32.mxu0 %v79_v22  ;;  %v22_v29 = vld [vmem:[%s401_s1 + $0x18] sm:$0xff]  ;;  %v37_v30 = vld [vmem:[%s401_s1 + $0x90] sm:$0xff]  ;;  %v36_v32 = vld [vmem:[%s401_s1 + $0x88] sm:$0xff] }
   0xb   :  { %210 = vmatpush3.msra.mxu0 %v30_v10  ;;  %v21_v31 = vld [vmem:[%s401_s1 + $0x10] sm:$0xff]  ;;  %v20_v33 = vld [vmem:[%s401_s1 + $0x8] sm:$0xff]  ;;  %v35_v34 = vld [vmem:[%s401_s1 + $0x80] sm:$0xff] }
   0xc   :  { %211 = vmatprep.subr.mxu0 %v45_v11  ;;  %v19_v35 = vld [vmem:[%s401_s1] sm:$0xff]  ;;  %s267_s1 = smov 1  }
   0xd   :  { %212 = vmatpush3.msra.mxu0 %v29_v12  ;;  %v200_v38 = vld [vmem:[%s402_s2] ss:$0 sm:$0xff] }
   0xe   :  { %213 = vmatprep.subr.mxu0 %v44_v13 }
   0xf   :  { %214 = vmatpush3.msra.mxu0 %v28_v14 }
  0x10   :  { %215 = vmatprep.subr.mxu0 %v43_v15 }
  0x11   :  { %216 = vmatpush3.msra.mxu0 %v27_v18 }
  0x12   :  { %217 = vmatprep.subr.mxu0 %v42_v19 }
  0x13   :  { %218 = vmatpush3.msra.mxu0 %v26_v20 }
  0x14   :  { %219 = vmatprep.subr.mxu0 %v41_v21 }
  0x15   :  { %220 = vmatpush3.msra.mxu0 %v25_v23 }
  0x16   :  { %221 = vmatprep.subr.mxu0 %v40_v24 }
  0x17   :  { %222 = vmatpush3.msra.mxu0 %v24_v25 }
  0x18   :  { %223 = vmatprep.subr.mxu0 %v39_v26 }
  0x19   :  { %224 = vmatpush3.msra.mxu0 %v23_v27 }
  0x1a   :  { %225 = vmatprep.subr.mxu0 %v38_v28 }
  0x1b   :  { %226 = vmatpush3.msra.mxu0 %v22_v29 }
  0x1c   :  { %227 = vmatprep.subr.mxu0 %v37_v30 }
  0x1d   :  { %228 = vmatpush3.msra.mxu0 %v21_v31 }
  0x1e   :  { %229 = vmatprep.subr.mxu0 %v36_v32 }
  0x1f   :  { %230 = vmatpush3.msra.mxu0 %v20_v33 }
  0x20   :  { %231 = vmatprep.subr.mxu0 %v35_v34 }
  0x21   :  { %232 = vmatpush3.msra.mxu0 %v19_v35 }
  0x22   :  { %147 = vmatmul.mubr.f32.vlgmr.msra.gmra.mxu0 %v78_v36 }
  0xe2   :  { %v233_v37 = vpop.f32.mrf.mxu0 }
  0xe4   :  { %v234_v39 = vpop.f32.mrf.mxu0 }
  0xe5   :  { %v235_v40 = vadd.f32 %v234_v39, %v233_v37 }
  0xe7   :  { %v149_v41 = vadd.f32 %v235_v40, %v200_v38 }
  0xe9   :  { %v155_v42 = vsel %vm154_vm0, %v149_v41, -inf }
  0xea   :  { %156 = vmax.xlane.f32.xlu0 %v155_v42 }
 0x173   :  { %v157_v44 = vpop.xlane.xlu0 %156 }
 0x174   :  { %vm158_vm1 = vcmp.eq.f32.partialorder %v149_v41, %v157_v44 }
 0x175   :  { %v159_v45 = vsel %vm158_vm1, %v153_v43, 5 }
 0x176   :  { %v160_v46 = vsel %vm154_vm0, %v159_v45, 2147483647 }
 0x177   :  { %v162_v47 = vshra.s32 %v160_v46, 16  ;;  %v161_v49 = vand.u32 65535, %v160_v46 }
 0x179   :  { %v164_v48 = vcvt.s32.f32 %v162_v47  ;;  %v163_v51 = vcvt.s32.f32 %v161_v49 }
 0x17b   :  { %165 = vmin.xlane.f32.xlu0 %v164_v48 }
 0x204   :  { %v166_v50 = vpop.xlane.xlu0 %165 }
 0x205   :  { %vm167_vm2 = vcmp.eq.f32.partialorder %v164_v48, %v166_v50  ;;  %v172_v53 = vcvt.f32.s32 %v166_v50 }
 0x206   :  { %v168_v52 = vsel %vm167_vm2, %v163_v51, inf }
 0x207   :  { %169 = vmin.xlane.f32.xlu1 %v168_v52  ;;  %v173_v55 = vshll.u32 %v172_v53, 16 }
 0x218   :  { %179 = vrot.lane.b32.xlu1 %v149_v41, %s267_s1 }
 0x290   :  { %v170_v54 = vpop.xlane.xlu1 %169 }
 0x291   :  { %v171_v56 = vcvt.f32.s32 %v170_v54 }
 0x293   :  { %v174_v57 = vadd.s32 %v173_v55, %v171_v56 }
 0x294   :  { %v180_v59 = vpop.permute.xlu1 %179 }
 0x295   :  { %v175_v58 = vcvt.s32.f32 %v174_v57 }
 0x297   :  { %177 = vst.msk [vmem:[#allocation2] sm:$0xff] %vm176_vm3, %v175_v58 }
 0x298   :  { %183 = vst.msk [vmem:[#allocation2] sm:$0xff] %vm182_vm4, %v180_v59 }
 0x299   :  { %188 = vsyncadd [#allocation3], 96  ;;  %s268_s2 = smov [#allocation2]  }
 0x29a   :  { %s189_s0 = sshll.u32 %s268_s2, 4  ;;  %s190_s0 = int_to_ptr.vmem [resolvable:$true] %s189_s0 }
 0x29b   :  { %s245_s27 = scalar_lea.vmem %s190_s0, 32  ;;  %s249_s28 = scalar_lea.vmem %s190_s0, 128 }
 0x29c   :  { %p246_p0 = scmp.ne.s32.totalorder %s190_s0, %s245_s27  ;;  %p250_p1 = scmp.lt.s32.totalorder %s190_s0, %s190_s0 }
 0x29d   :  { %p251_p2 = scmp.lt.s32.totalorder %s249_s28, %s245_s27 }
 0x29f   :  { %p252_p3 = por %p251_p2, %p250_p1 }
 0x2a1   :  { %p253_p4 = pnand %p252_p3, %p246_p0 }
 0x2a3   :  { %256 = shalt.err (!%p253_p4)
}
 0x2a4   :  { %s269_s29 = smov 32   ;;  %s270_s30 = smov 2  }
 0x2a5   :  { %195 = dma.vmem_to_hbm [thread:$0]  %s190_s0, 32, %s403_s3, [#allocation3], %s269_s29, %s269_s29, %s270_s30  }
 0x2a6   :  { %265 = dma.done.wait [#allocation3], 128  }
 0x2a7   :  { %266 = vsyncadd [#allocation3], 4294967168 }
 0x2a8   :  { %199 = vsyncpa [#allocation3], 1 }

</bundles_post_ra>
